<compile_context>
chip_gen: v7x
topology: tpu7x:2x2x1
jax: 0.10.0
libtpu: 0.0.40
codegen_flags: <defaults>
</compile_context>

<pallas_src>
import numpy as np
import jax
import jax.numpy as jnp
from jax.experimental import pallas as pl
from jax.experimental.pallas import tpu as pltpu

K_CONST = 0.5  # BaseModel default k


def _weighted_average_kernel(x_ref, resp_ref, s_ref, params_ref, out_ref):
    # params_ref (SMEM) holds [scale, p].
    scale = jnp.maximum(params_ref[0], 0.0)          # relu(scale)    (scalar)
    p = jnp.clip(params_ref[1], 0.0, 1.0)            # clamp(p, 0, 1) (scalar)

    # process_s_scale: relu + normalize ensemble weights.  s is (M, 1).
    s_relu = jnp.maximum(s_ref[...], 0.0)
    s_norm = s_relu / jnp.sum(s_relu, keepdims=True)                       # (M, 1)

    # weighted_mean = s_norm @ X, computed lane-dense as a broadcast multiply
    # over (M, N) followed by a sublane (axis 0) reduction.
    weighted_mean = jnp.sum(s_norm * x_ref[...], axis=0, keepdims=True)    # (1, N)

    # raw_mean_likelihood
    dist = jnp.pi / 4.0 - jnp.abs(weighted_mean - resp_ref[...])           # (1, N)
    model_likelihood = jax.nn.sigmoid(scale * dist)                        # (1, N)

    # total_log_likelihood
    total = p * K_CONST + (1.0 - p) * model_likelihood                     # (1, N)
    out_ref[...] = -jnp.sum(jnp.log(total * 0.99 + 0.005), keepdims=True)  # (1, 1)


def weighted_average(X, resp, s, scale, p):
    """Pallas forward for WeightedAverage.  X: (M, N), resp: (N,), s: (M,)."""
    M, N = X.shape
    x2 = X.astype(jnp.float32)                         # (M, N): items x trials
    resp2 = resp.reshape(1, N).astype(jnp.float32)     # trials on the lane axis
    s2 = s.reshape(M, 1).astype(jnp.float32)           # items on the sublane axis
    params = jnp.array([scale, p], dtype=jnp.float32)  # (2,) scalars -> SMEM

    out = pl.pallas_call(
        _weighted_average_kernel,
        out_shape=jax.ShapeDtypeStruct((1, 1), jnp.float32),
        in_specs=[
            pl.BlockSpec(memory_space=pltpu.MemorySpace.VMEM),   # X      (M, N)
            pl.BlockSpec(memory_space=pltpu.MemorySpace.VMEM),   # resp   (1, N)
            pl.BlockSpec(memory_space=pltpu.MemorySpace.VMEM),   # s      (M, 1)
            pl.BlockSpec(memory_space=pltpu.MemorySpace.SMEM),   # [scale, p]
        ],
        out_specs=pl.BlockSpec(memory_space=pltpu.MemorySpace.VMEM),
    )(x2, resp2, s2, params)
    return out[0, 0]


def weighted_average_reference(X, resp, s, scale, p, k=K_CONST):
    """Pure-JAX reference mirroring the PyTorch WeightedAverage.forward."""
    scale_r = jnp.maximum(scale, 0.0)
    s_r = jnp.maximum(s, 0.0)
    s_n = s_r / jnp.sum(s_r)
    weighted_mean = s_n @ X                                  # (N,)
    dist = jnp.pi / 4.0 - jnp.abs(weighted_mean - resp)
    model_likelihood = jax.nn.sigmoid(scale_r * dist)
    p_c = jnp.clip(p, 0.0, 1.0)
    total = p_c * k + (1.0 - p_c) * model_likelihood
    return -jnp.sum(jnp.log(total * 0.99 + 0.005))


if __name__ == "__main__":
    M, N = 8, 128   # n_items (ensemble size), n_trials

    key = jax.random.PRNGKey(0)
    k_x, k_resp, k_s = jax.random.split(key, 3)

    # Orientations/responses in degrees, converted to radians as in set_data().
    X_deg = jax.random.uniform(k_x, (M, N), dtype=jnp.float32) * 180.0
    resp_deg = jax.random.uniform(k_resp, (N,), dtype=jnp.float32) * 180.0
    X = X_deg * (jnp.pi / 180.0)
    resp = resp_deg * (jnp.pi / 180.0)
    s = jax.random.uniform(k_s, (M,), dtype=jnp.float32) + 0.1   # ensemble weights
    scale = jnp.float32(5.0)
    p = jnp.float32(0.3)

    out = weighted_average(X, resp, s, scale, p)
    out = jax.block_until_ready(out)

    ref = weighted_average_reference(X, resp, s, scale, p)
    ref = jax.block_until_ready(ref)

    np.testing.assert_allclose(np.asarray(out), np.asarray(ref), rtol=1e-3, atol=1e-4)
    print("KERNEL_OK")
</pallas_src>

<mosaic_0001>
module attributes {stable_mosaic.version = 11 : i64} {
  func.func @_weighted_average_kernel(%arg0: memref<8x128xf32, #tpu.memory_space<vmem>>, %arg1: memref<1x128xf32, #tpu.memory_space<vmem>>, %arg2: memref<8x1xf32, #tpu.memory_space<vmem>>, %arg3: memref<2xf32, #tpu.memory_space<smem>>, %arg4: memref<1x1xf32, #tpu.memory_space<vmem>>) attributes {dimension_semantics = [], scalar_prefetch = 0 : i64, scratch_operands = 0 : i64, tpu.core_type = #tpu.core_type<tc>} {
    %c0 = arith.constant 0 : index
    %0 = memref.load %arg3[%c0] : memref<2xf32, #tpu.memory_space<smem>>
    %cst = arith.constant 0.000000e+00 : f32
    %1 = arith.maximumf %0, %cst : f32
    %c1 = arith.constant 1 : index
    %2 = memref.load %arg3[%c1] : memref<2xf32, #tpu.memory_space<smem>>
    %cst_0 = arith.constant 0.000000e+00 : f32
    %cst_1 = arith.constant 1.000000e+00 : f32
    %3 = arith.maximumf %cst_0, %2 : f32
    %4 = arith.minimumf %cst_1, %3 : f32
    %c0_2 = arith.constant 0 : index
    %c0_3 = arith.constant 0 : index
    %5 = vector.load %arg2[%c0_2, %c0_3] : memref<8x1xf32, #tpu.memory_space<vmem>>, vector<8x1xf32>
    %cst_4 = arith.constant 0.000000e+00 : f32
    %6 = vector.broadcast %cst_4 : f32 to vector<8x1xf32>
    %7 = arith.maximumf %5, %6 : vector<8x1xf32>
    %8 = vector.shape_cast %7 : vector<8x1xf32> to vector<1x8x1xf32>
    %cst_5 = arith.constant dense<0.000000e+00> : vector<1xf32>
    %9 = vector.multi_reduction <add>, %8, %cst_5 [1, 2] : vector<1x8x1xf32> to vector<1xf32>
    %10 = vector.shape_cast %9 : vector<1xf32> to vector<1x1x1xf32>
    %11 = vector.extract %10[0, 0, 0] : f32 from vector<1x1x1xf32>
    %12 = vector.broadcast %11 : f32 to vector<1x1xf32>
    %13 = vector.broadcast %12 : vector<1x1xf32> to vector<8x1xf32>
    %14 = arith.divf %7, %13 : vector<8x1xf32>
    %c0_6 = arith.constant 0 : index
    %c0_7 = arith.constant 0 : index
    %15 = vector.load %arg0[%c0_6, %c0_7] : memref<8x128xf32, #tpu.memory_space<vmem>>, vector<8x128xf32>
    %16 = vector.broadcast %14 : vector<8x1xf32> to vector<8x128xf32>
    %17 = arith.mulf %16, %15 : vector<8x128xf32>
    %cst_8 = arith.constant dense<0.000000e+00> : vector<128xf32>
    %18 = vector.multi_reduction <add>, %17, %cst_8 [0] : vector<8x128xf32> to vector<128xf32>
    %19 = vector.shape_cast %18 : vector<128xf32> to vector<1x128xf32>
    %c0_9 = arith.constant 0 : index
    %c0_10 = arith.constant 0 : index
    %20 = vector.load %arg1[%c0_9, %c0_10] : memref<1x128xf32, #tpu.memory_space<vmem>>, vector<1x128xf32>
    %21 = arith.subf %19, %20 : vector<1x128xf32>
    %22 = math.absf %21 : vector<1x128xf32>
    %cst_11 = arith.constant 0.785398185 : f32
    %23 = vector.broadcast %cst_11 : f32 to vector<1x128xf32>
    %24 = arith.subf %23, %22 : vector<1x128xf32>
    %25 = vector.broadcast %1 : f32 to vector<1x128xf32>
    %26 = arith.mulf %25, %24 : vector<1x128xf32>
    %27 = arith.negf %26 : vector<1x128xf32>
    %28 = math.exp %27 : vector<1x128xf32>
    %cst_12 = arith.constant 1.000000e+00 : f32
    %29 = vector.broadcast %cst_12 : f32 to vector<1x128xf32>
    %30 = arith.addf %29, %28 : vector<1x128xf32>
    %31 = arith.divf %29, %30 : vector<1x128xf32>
    %cst_13 = arith.constant 5.000000e-01 : f32
    %32 = arith.mulf %4, %cst_13 : f32
    %cst_14 = arith.constant 1.000000e+00 : f32
    %33 = arith.subf %cst_14, %4 : f32
    %34 = vector.broadcast %33 : f32 to vector<1x128xf32>
    %35 = arith.mulf %34, %31 : vector<1x128xf32>
    %36 = vector.broadcast %32 : f32 to vector<1x128xf32>
    %37 = arith.addf %36, %35 : vector<1x128xf32>
    %cst_15 = arith.constant 9.900000e-01 : f32
    %38 = vector.broadcast %cst_15 : f32 to vector<1x128xf32>
    %39 = arith.mulf %37, %38 : vector<1x128xf32>
    %cst_16 = arith.constant 5.000000e-03 : f32
    %40 = vector.broadcast %cst_16 : f32 to vector<1x128xf32>
    %41 = arith.addf %39, %40 : vector<1x128xf32>
    %42 = math.log %41 : vector<1x128xf32>
    %43 = vector.shape_cast %42 : vector<1x128xf32> to vector<1x1x128xf32>
    %cst_17 = arith.constant dense<0.000000e+00> : vector<1xf32>
    %44 = vector.multi_reduction <add>, %43, %cst_17 [1, 2] : vector<1x1x128xf32> to vector<1xf32>
    %45 = vector.shape_cast %44 : vector<1xf32> to vector<1x1x1xf32>
    %46 = vector.extract %45[0, 0, 0] : f32 from vector<1x1x1xf32>
    %47 = vector.broadcast %46 : f32 to vector<1x1xf32>
    %cst_18 = arith.constant 0.000000e+00 : f32
    %48 = vector.broadcast %cst_18 : f32 to vector<1x1xf32>
    %49 = arith.subf %48, %47 : vector<1x1xf32>
    %c0_19 = arith.constant 0 : index
    %c0_20 = arith.constant 0 : index
    %50 = vector.load %arg4[%c0_19, %c0_20] : memref<1x1xf32, #tpu.memory_space<vmem>>, vector<1x1xf32>
    tpu.vector_store %arg4[%c0_19, %c0_20], %49 {strides = array<i32>} : memref<1x1xf32, #tpu.memory_space<vmem>>, vector<1x1xf32>,
    return
  }
}

</mosaic_0001>

<bundles_post_ra>
// kernel: tpu_custom_call.1
= control target key start
LH: loop header
LB: loop body
LE: loop exit
PB: predicated region body
PF: predicated region fallthrough
CT: control target
= control target key end

     0   :  { %9 = vsyncpa [#allocation4], 0  ;;  %s229_s0 = inlined_call_operand.vmem [shape: f32[8,128], index: 0, kind: input, shape index: {}]   ;;  %s230_s1 = inlined_call_operand.vmem [shape: f32[1,128], index: 1, kind: input, shape index: {}]   ;;  %s231_s2 = inlined_call_operand.vmem [shape: f32[8,1], index: 2, kind: input, shape index: {}]   ;;  %s232_s3 = inlined_call_operand.vmem [shape: f32[2], index: 3, kind: input, shape index: {}]   ;;  %s233_s4 = inlined_call_operand.hbm [shape: f32[1,1], index: 4, kind: output, shape index: {}]  }
   0x1   :  { %10 = vsyncpa [#allocation3], 0  ;;  %s23_s17 = sshll.u32 %s232_s3, 4  ;;  %s24_s17 = int_to_ptr.vmem [resolvable:$true] %s23_s17 }
   0x2   :  { %s137_s18 = scalar_lea.vmem %s24_s17, 16  ;;  %p142_p1 = scmp.lt.s32.totalorder %s24_s17, %s24_s17 }
   0x3   :  { %p138_p0 = scmp.ne.s32.totalorder %s24_s17, %s137_s18  ;;  %p143_p2 = scmp.lt.s32.totalorder %s137_s18, %s137_s18 }
   0x5   :  { %p144_p3 = por %p143_p2, %p142_p1 }
   0x7   :  { %p145_p4 = pnand %p144_p3, %p138_p0 }
   0x9   :  { %148 = shalt.err (!%p145_p4)
}
   0xa   :  { %s175_s19 = smov [#allocation2]  }
   0xb   :  { %26 = dma.vmem_to_smem %s24_s17, 16, %s175_s19, [#allocation4]  }
   0xc   :  { %171 = dma.done.wait [#allocation4], 16  }
   0xd   :  { %172 = vsyncadd [#allocation4], 4294967280 }
   0xe   :  { %30 = sfence }
   0xf   :  { %v36_v0 = vld [vmem:[%s231_s2] sm:$0xff]  ;;  %vm38_vm0 = vcmask 7168   ;;  %v176_v3 = vmov 0   ;;  %s31_s23 = sld [smem:[#allocation2]]  ;;  %s177_s26 = smov 0.0   ;;  %vm87_vm1 = vcmask 1040384  }
  0x10   :  { %v37_v1 = vmax.f32 %v36_v0, 0.0  ;;  %128 = vset.pattern.permute.xlu0 %v176_v3  ;;  %v52_v14 = vld [vmem:[%s229_s0] sm:$0xff]  ;;  %s117_s0 = sld [smem:[#allocation2 + $0x1]]  ;;  %s178_s29 = smov 1.0   ;;  %vm100_vm2 = vcmask 0  }
  0x11   :  { %v65_v22 = vld [vmem:[%s230_s1] sm:$0x1]  ;;  %s179_s1 = smov [#allocation5]  }
  0x12   :  { %v39_v2 = vsel %vm38_vm0, %v37_v1, 0.0  ;;  %s108_s7 = sshll.u32 %s179_s1, 4  ;;  %s109_s7 = int_to_ptr.vmem [resolvable:$true] %s108_s7 }
  0x13   :  { %40 = vadd.xlane.f32.xlu0 %v39_v2  ;;  %s149_s9 = scalar_lea.vmem %s109_s7, 16  ;;  %s153_s10 = scalar_lea.vmem %s109_s7, 32 }
  0x14   :  { %p150_p5 = scmp.ne.s32.totalorder %s109_s7, %s149_s9  ;;  %p154_p6 = scmp.lt.s32.totalorder %s109_s7, %s109_s7 }
  0x15   :  { %s32_s27 = smax.f32 %s177_s26, %s31_s23  ;;  %p155_p7 = scmp.lt.s32.totalorder %s153_s10, %s149_s9 }
  0x16   :  { %v69_v26 = vstv %s32_s27  ;;  %s34_s28 = smax.f32 %s177_s26, %s117_s0 }
  0x17   :  { %s35_s30 = smin.f32 %s178_s29, %s34_s28  ;;  %p156_p8 = por %p155_p7, %p154_p6 }
  0x18   :  { %s78_s5 = ssub.f32 1.0, %s35_s30  ;;  %s77_s6 = smul.f32 0.5, %s35_s30 }
  0x19   :  { %p157_p9 = pnand %p156_p8, %p150_p5 }
  0x1a   :  { %v79_v32 = vstv %s78_s5  ;;  %v81_v34 = vstv %s77_s6 }
  0xa0   :  { %v41_v4 = vpop.xlane.xlu0 %40 }
  0xa1   :  { %v42_v5 = vrot.slane %v41_v4, 4 }
  0xa3   :  { %v43_v6 = vadd.f32 %v42_v5, %v41_v4 }
  0xa5   :  { %v44_v7 = vrot.slane %v43_v6, 2 }
  0xa7   :  { %v45_v8 = vadd.f32 %v44_v7, %v43_v6 }
  0xa9   :  { %v46_v9 = vrot.slane %v45_v8, 1 }
  0xab   :  { %v47_v10 = vadd.f32 %v46_v9, %v45_v8 }
  0xad   :  { %119 = vpush %v47_v10 }
  0xde   :  { %s120_s3 = spop %119 }
  0xdf   :  { %v49_v11 = vstv %s120_s3 }
  0xe0   :  { %129 = vrcp.f32 %v49_v11 }
  0xea   :  { %v130_v12 = vpop.eup %129 }
  0xeb   :  { %v51_v13 = vmul.f32 %v130_v12, %v37_v1 }
  0xed   :  { %55 = vperm.xlu0 %128, %v51_v13  }
 0x16c   :  { %v56_v15 = vpop.permute.xlu0 %55 }
 0x16d   :  { %v58_v16 = vmul.f32 %v56_v15, %v52_v14 }
 0x16f   :  { %v59_v17 = vrot.slane %v58_v16, 4 }
 0x171   :  { %v60_v18 = vadd.f32 %v59_v17, %v58_v16 }
 0x173   :  { %v61_v19 = vrot.slane %v60_v18, 2 }
 0x175   :  { %v62_v20 = vadd.f32 %v61_v19, %v60_v18 }
 0x177   :  { %v63_v21 = vrot.slane %v62_v20, 1 }
 0x179   :  { %v64_v23 = vadd.f32 %v63_v21, %v62_v20 }
 0x17b   :  { %v66_v24 = vsub.f32 %v64_v23, %v65_v22 }
 0x17d   :  { %v67_v25 = vand.u32 2147483647, %v66_v24 }
 0x17f   :  { %v68_v27 = vsub.f32 0.7853982, %v67_v25 }
 0x181   :  { %v70_v28 = vmul.f32 %v69_v26, %v68_v27 }
 0x183   :  { %v118_v29 = vmul.f32 -1.442695, %v70_v28 }
 0x185   :  { %131 = vpow2.f32 %v118_v29 }
 0x18f   :  { %v132_v30 = vpop.eup %131 }
 0x190   :  { %v74_v31 = vadd.f32 1.0, %v132_v30 }
 0x192   :  { %133 = vrcp.f32 %v74_v31 }
 0x19c   :  { %v134_v33 = vpop.eup %133 }
 0x19d   :  { %v80_v35 = vmul.f32 %v134_v33, %v79_v32 }
 0x19f   :  { %v82_v36 = vadd.f32 %v81_v34, %v80_v35 }
 0x1a1   :  { %v83_v37 = vmul.f32 0.99, %v82_v36 }
 0x1a3   :  { %v84_v38 = vadd.f32 0.005, %v83_v37 }
 0x1a5   :  { %135 = vlog2.f32 %v84_v38 }
 0x1af   :  { %v136_v39 = vpop.eup %135 }
 0x1b0   :  { %v86_v40 = vmul.f32 0.6931472, %v136_v39 }
 0x1b2   :  { %v88_v41 = vsel %vm87_vm1, %v86_v40, 0.0 }
 0x1b3   :  { %89 = vadd.xlane.f32.xlu1 %v88_v41 }
 0x240   :  { %v90_v42 = vpop.xlane.xlu1 %89 }
 0x241   :  { %v91_v43 = vrot.slane %v90_v42, 4 }
 0x243   :  { %v92_v44 = vadd.f32 %v91_v43, %v90_v42 }
 0x245   :  { %v93_v45 = vrot.slane %v92_v44, 2 }
 0x247   :  { %v94_v46 = vadd.f32 %v93_v45, %v92_v44 }
 0x249   :  { %v95_v47 = vrot.slane %v94_v46, 1 }
 0x24b   :  { %v96_v48 = vadd.f32 %v95_v47, %v94_v46 }
 0x24d   :  { %121 = vpush %v96_v48 }
 0x27e   :  { %s122_s8 = spop %121 }
 0x27f   :  { %v98_v49 = vstv %s122_s8 }
 0x280   :  { %v99_v50 = vsub.f32 0.0, %v98_v49 }
 0x282   :  { %101 = vst.msk [vmem:[#allocation5] sm:$0x1] %vm100_vm2, %v99_v50 }
 0x283   :  { %160 = shalt.err (!%p157_p9)
}
 0x284   :  { %s161_s13 = scalar_lea.hbm %s233_s4, 16 }
 0x285   :  { %p162_p10 = scmp.ne.s32.totalorder %s233_s4, %s161_s13  ;;  %p165_p11 = scmp.lt.u32.totalorder %s161_s13, %s233_s4 }
 0x287   :  { %p167_p12 = pnand %p165_p11, %p162_p10 }
 0x289   :  { %170 = shalt.err (!%p167_p12)
}
 0x28a   :  { %111 = dma.vmem_to_hbm [thread:$0]  %s109_s7, 16, %s233_s4, [#allocation3]  }
 0x28b   :  { %173 = dma.done.wait [#allocation3], 16  }
 0x28c   :  { %174 = vsyncadd [#allocation3], 4294967280 }
 0x28d   :  { %115 = vsyncpa [#allocation3], 1 }
 0x28e   :  { %116 = vsyncpa [#allocation4], 1 }

</bundles_post_ra>
